<compile_context>
chip_gen: v7x
topology: tpu7x:2x2x1
jax: 0.10.0
libtpu: 0.0.40
codegen_flags: <defaults>
</compile_context>

<pallas_src>
import jax
import jax.numpy as jnp
from jax.experimental import pallas as pl
from jax.experimental.pallas import tpu as pltpu

_LANE = 128
_MIB = 1024 * 1024
# Conservative per-step VMEM budget that fits every generation (v7x has
# 64 MiB/TC with a 32 MiB scoped default; we only request what we need).
_VMEM_BUDGET = 40 * _MIB
_VMEM_CAP = 48 * _MIB


def _round_up(v, m):
    return ((v + m - 1) // m) * m


def _vmem_bytes(tm, tk, Fp, Hp, num_k, in_bytes):
    """Approximate VMEM footprint of one grid step (all live buffers)."""
    a = 2 * tm * tk * in_bytes                          # A stripe, double-buffered
    x = (1 if num_k == 1 else 2) * tk * Fp * in_bytes   # X chunk
    wt = Fp * Hp * 4                                    # f32 W.T, single-buffered
    b = 8 * Hp * 4                                      # bias (sublane-padded)
    out = 2 * tm * Hp * 4                               # output tile
    acc = tm * Fp * 4                                   # f32 accumulator scratch
    return a + x + wt + b + out + acc


# ----------------------------------------------------------------------------
# Fused kernel, grid = (row_tiles "parallel", k_tiles "arbitrary"):
#   acc[i]  += A[i, k] @ X[k]          (f32 accumulate over the k axis)
#   OUT[i]   = acc[i] @ Wt + bias      (only at the last k step)
#
#   a_ref  : [tm, tk]  row/col tile of padded normalized adjacency
#   x_ref  : [tk, Fp]  padded node-feature chunk
#   wt_ref : [Fp, Hp]  padded W.T (f32, resident, single-buffered)
#   b_ref  : [1,  Hp]  padded bias (f32, resident, single-buffered)
#   o_ref  : [tm, Hp]
#   acc_ref: [tm, Fp]  f32 VMEM scratch
# ----------------------------------------------------------------------------
def _gcn_fused_kernel(a_ref, x_ref, wt_ref, b_ref, o_ref, acc_ref):
    k = pl.program_id(1)

    @pl.when(k == 0)
    def _():
        acc_ref[...] = jnp.zeros_like(acc_ref)

    acc_ref[...] += jnp.dot(a_ref[...], x_ref[...],
                            preferred_element_type=jnp.float32)

    @pl.when(k == pl.num_programs(1) - 1)
    def _():
        # Keep the aggregated features in f32 for the (tiny) projection matmul:
        # avoids bf16 requantization error on large degree sums.
        h = jnp.dot(acc_ref[...], wt_ref[...],
                    preferred_element_type=jnp.float32)
        o_ref[...] = (h + b_ref[...]).astype(o_ref.dtype)


def gcn_encoder_spmm_forward(x, adj_norm_dense, weight, bias, *,
                             tm=128, tk_max=4096, use_bf16=True):
    """x: [N, F] f32, adj_norm_dense: [N, N] (or pre-padded/cast),
    weight: [H, F] f32 (torch Linear layout), bias: [H] f32 -> [N, H] f32."""
    N, F = x.shape
    H = weight.shape[0]

    Fp = _round_up(F, _LANE)
    Hp = _round_up(H, _LANE)

    in_dtype = jnp.bfloat16 if use_bf16 else jnp.float32
    in_bytes = 2 if use_bf16 else 4

    # ---- Row tiling: keep >= 2 row tiles so "parallel" can use both v7x TCs.
    Np_r = _round_up(N, _LANE)
    tm = max(8, min(tm, Np_r))
    if Np_r // tm < 2 and Np_r >= 16:
        tm = Np_r // 2
    tm = (tm // 8) * 8
    while Np_r % tm:
        tm -= 8

    # ---- K tiling of the A@X contraction: largest 128-multiple chunk whose
    # per-step footprint stays inside the cross-generation VMEM budget.
    tk = min(_round_up(N, _LANE), _round_up(tk_max, _LANE))
    while tk > _LANE and _vmem_bytes(tm, tk, Fp, Hp, 2, in_bytes) > _VMEM_BUDGET:
        tk -= _LANE
    Np_k = _round_up(N, tk)
    num_k = Np_k // tk

    est = _vmem_bytes(tm, tk, Fp, Hp, num_k, in_bytes)
    vmem_limit = int(min(max(est + 6 * _MIB, 16 * _MIB), _VMEM_CAP))

    # ---- Pad + cast operands.  Zero padding is exact (padded rows/cols
    # contribute nothing to the matmuls).  The O(N^2) adjacency pad/cast is
    # skipped when the caller already supplies it padded + cast (do that once
    # outside a training loop to avoid paying ~3x the kernel's A bytes here).
    if adj_norm_dense.shape == (Np_r, Np_k) and adj_norm_dense.dtype == in_dtype:
        a_p = adj_norm_dense
    elif adj_norm_dense.shape == (Np_r, Np_k):
        a_p = adj_norm_dense.astype(in_dtype)
    else:
        a_p = jnp.zeros((Np_r, Np_k), in_dtype).at[:N, :N].set(
            adj_norm_dense[:N, :N].astype(in_dtype))
    x_p = jnp.zeros((Np_k, Fp), in_dtype).at[:N, :F].set(x.astype(in_dtype))
    # W.T and bias stay f32: tiny, keeps the projection matmul fully f32.
    wt_p = jnp.zeros((Fp, Hp), jnp.float32).at[:F, :H].set(
        weight.T.astype(jnp.float32))
    b_p = jnp.zeros((1, Hp), jnp.float32).at[0, :H].set(
        bias.astype(jnp.float32))

    # Constant-index (resident) operands -> single-buffered.
    if num_k == 1:
        x_spec = pl.BlockSpec((tk, Fp), lambda i, k: (k, 0),
                              pipeline_mode=pl.Buffered(1))
    else:
        x_spec = pl.BlockSpec((tk, Fp), lambda i, k: (k, 0))
    wt_spec = pl.BlockSpec((Fp, Hp), lambda i, k: (0, 0),
                           pipeline_mode=pl.Buffered(1))
    b_spec = pl.BlockSpec((1, Hp), lambda i, k: (0, 0),
                          pipeline_mode=pl.Buffered(1))

    out_p = pl.pallas_call(
        _gcn_fused_kernel,
        out_shape=jax.ShapeDtypeStruct((Np_r, Hp), jnp.float32),
        grid_spec=pltpu.PrefetchScalarGridSpec(
            num_scalar_prefetch=0,
            grid=(Np_r // tm, num_k),
            in_specs=[
                pl.BlockSpec((tm, tk), lambda i, k: (i, k)),   # A tile
                x_spec,                                        # X chunk
                wt_spec,                                       # W.T (resident)
                b_spec,                                        # bias (resident)
            ],
            out_specs=pl.BlockSpec((tm, Hp), lambda i, k: (i, 0)),
            scratch_shapes=[pltpu.VMEM((tm, Fp), jnp.float32)],
        ),
        compiler_params=pltpu.CompilerParams(
            dimension_semantics=("parallel", "arbitrary"),
            vmem_limit_bytes=vmem_limit,
        ),
    )(a_p, x_p, wt_p, b_p)

    # NOTE: padded output rows contain only the bias; this slice is required.
    return out_p[:N, :H]


# ----------------------------------------------------------------------------
# Helpers: deterministic synthetic graph + normalized adjacency
# ----------------------------------------------------------------------------
def build_adj_norm(edge_index, num_nodes):
    """Dense symmetric-normalized adjacency with self loops:
    A_norm = D^{-1/2} (A + I) D^{-1/2}."""
    src, dst = edge_index
    adj = jnp.zeros((num_nodes, num_nodes), jnp.float32)
    adj = adj.at[src, dst].set(1.0)
    adj = adj.at[dst, src].set(1.0)                    # symmetrize
    adj = adj + jnp.eye(num_nodes, dtype=jnp.float32)  # self loops
    adj = jnp.minimum(adj, 1.0)
    deg = adj.sum(axis=1)
    d_inv_sqrt = 1.0 / jnp.sqrt(jnp.maximum(deg, 1e-12))
    return adj * d_inv_sqrt[:, None] * d_inv_sqrt[None, :]


if __name__ == "__main__":
    # Small shapes consistent with the module: N nodes, F in-features, H hidden.
    N, F, H = 64, 16, 32
    NUM_EDGES = 128

    key = jax.random.PRNGKey(0)
    kx, kw, kb, ke1, ke2 = jax.random.split(key, 5)

    # Node features
    x = jax.random.normal(kx, (N, F), dtype=jnp.float32)

    # Parameters (torch Linear: weight [hidden, num_features], bias [hidden])
    bound = 1.0 / (F ** 0.5)
    weight = jax.random.uniform(kw, (H, F), jnp.float32, -bound, bound)
    bias = jax.random.uniform(kb, (H,), jnp.float32, -bound, bound)

    # Synthetic edge_index [2, E] and normalized dense adjacency
    src = jax.random.randint(ke1, (NUM_EDGES,), 0, N)
    dst = jax.random.randint(ke2, (NUM_EDGES,), 0, N)
    edge_index = jnp.stack([src, dst])
    adj_norm = build_adj_norm(edge_index, N)

    # Pure-JAX reference (PyTorch semantics, f32)
    ref = adj_norm @ (x @ weight.T) + bias[None, :]

    # f32 path: exact (up to f32 reassociation) check.
    out_f32 = gcn_encoder_spmm_forward(x, adj_norm, weight, bias,
                                       use_bf16=False)
    out_f32 = jax.block_until_ready(out_f32)
    assert out_f32.shape == (N, H)
    assert jnp.allclose(out_f32, ref, atol=1e-4, rtol=1e-4), "f32 mismatch"

    # bf16 MXU-input path (performance config): loosened tolerance.
    out_bf16 = gcn_encoder_spmm_forward(x, adj_norm, weight, bias,
                                        use_bf16=True)
    out_bf16 = jax.block_until_ready(out_bf16)
    assert out_bf16.shape == (N, H)
    assert jnp.allclose(out_bf16, ref, atol=5e-2, rtol=5e-2), "bf16 mismatch"

    print("KERNEL_OK")
</pallas_src>

<mosaic_0001>
module attributes {stable_mosaic.version = 11 : i64} {
  func.func @_gcn_fused_kernel(%arg0: i32, %arg1: i32, %arg2: memref<64x128xf32, #tpu.memory_space<vmem>>, %arg3: memref<128x128xf32, #tpu.memory_space<vmem>>, %arg4: memref<128x128xf32, #tpu.memory_space<vmem>>, %arg5: memref<1x128xf32, #tpu.memory_space<vmem>>, %arg6: memref<64x128xf32, #tpu.memory_space<vmem>>, %arg7: memref<64x128xf32, #tpu.memory_space<vmem>>) attributes {dimension_semantics = [#tpu.dimension_semantics<parallel>, #tpu.dimension_semantics<arbitrary>], iteration_bounds = array<i64: 2, 1>, scalar_prefetch = 0 : i64, scratch_operands = 1 : i64, tpu.core_type = #tpu.core_type<tc>, window_params = [{transform_indices = @transform_0, window_bounds = array<i64: 64, 128>}, {pipeline_mode = #tpu.pipeline_mode<synchronous>, transform_indices = @transform_1, window_bounds = array<i64: 128, 128>}, {pipeline_mode = #tpu.pipeline_mode<synchronous>, transform_indices = @transform_2, window_bounds = array<i64: 128, 128>}, {pipeline_mode = #tpu.pipeline_mode<synchronous>, transform_indices = @transform_3, window_bounds = array<i64: 1, 128>}, {transform_indices = @transform_4, window_bounds = array<i64: 64, 128>}]} {
    %c0_i32 = arith.constant 0 : i32
    %0 = arith.cmpi eq, %arg1, %c0_i32 : i32
    %1 = arith.extui %0 : i1 to i32
    %c0_i32_0 = arith.constant 0 : i32
    %2 = arith.cmpi ne, %1, %c0_i32_0 : i32
    scf.if %2 {
      %cst_10 = arith.constant 0.000000e+00 : f32
      %12 = vector.broadcast %cst_10 : f32 to vector<64x128xf32>
      %c0_11 = arith.constant 0 : index
      %c0_12 = arith.constant 0 : index
      %13 = vector.load %arg7[%c0_11, %c0_12] : memref<64x128xf32, #tpu.memory_space<vmem>>, vector<64x128xf32>
      tpu.vector_store %arg7[%c0_11, %c0_12], %12 {strides = array<i32>} : memref<64x128xf32, #tpu.memory_space<vmem>>, vector<64x128xf32>,
    } else {
    }
    %c0 = arith.constant 0 : index
    %c0_1 = arith.constant 0 : index
    %3 = vector.load %arg7[%c0, %c0_1] : memref<64x128xf32, #tpu.memory_space<vmem>>, vector<64x128xf32>
    %c0_2 = arith.constant 0 : index
    %c0_3 = arith.constant 0 : index
    %4 = vector.load %arg2[%c0_2, %c0_3] : memref<64x128xf32, #tpu.memory_space<vmem>>, vector<64x128xf32>
    %c0_4 = arith.constant 0 : index
    %c0_5 = arith.constant 0 : index
    %5 = vector.load %arg3[%c0_4, %c0_5] : memref<128x128xf32, #tpu.memory_space<vmem>>, vector<128x128xf32>
    %cst = arith.constant dense<0.000000e+00> : vector<64x128xf32>
    %6 = tpu.matmul %4, %5, %cst {dimension_numbers = #tpu.dot_dimension_numbers<[1], [0], [0], [1], [0, 0, 1, 1], [], []>} : vector<64x128xf32>, vector<128x128xf32>, vector<64x128xf32> -> vector<64x128xf32>
    %7 = arith.addf %3, %6 : vector<64x128xf32>
    %c0_6 = arith.constant 0 : index
    %c0_7 = arith.constant 0 : index
    %8 = vector.load %arg7[%c0_6, %c0_7] : memref<64x128xf32, #tpu.memory_space<vmem>>, vector<64x128xf32>
    tpu.vector_store %arg7[%c0_6, %c0_7], %7 {strides = array<i32>} : memref<64x128xf32, #tpu.memory_space<vmem>>, vector<64x128xf32>,
    %c0_i32_8 = arith.constant 0 : i32
    %9 = arith.cmpi eq, %arg1, %c0_i32_8 : i32
    %10 = arith.extui %9 : i1 to i32
    %c0_i32_9 = arith.constant 0 : i32
    %11 = arith.cmpi ne, %10, %c0_i32_9 : i32
    scf.if %11 {
      %c0_10 = arith.constant 0 : index
      %c0_11 = arith.constant 0 : index
      %12 = vector.load %arg7[%c0_10, %c0_11] : memref<64x128xf32, #tpu.memory_space<vmem>>, vector<64x128xf32>
      %c0_12 = arith.constant 0 : index
      %c0_13 = arith.constant 0 : index
      %13 = vector.load %arg4[%c0_12, %c0_13] : memref<128x128xf32, #tpu.memory_space<vmem>>, vector<128x128xf32>
      %cst_14 = arith.constant dense<0.000000e+00> : vector<64x128xf32>
      %14 = tpu.matmul %12, %13, %cst_14 {dimension_numbers = #tpu.dot_dimension_numbers<[1], [0], [0], [1], [0, 0, 1, 1], [], []>} : vector<64x128xf32>, vector<128x128xf32>, vector<64x128xf32> -> vector<64x128xf32>
      %c0_15 = arith.constant 0 : index
      %c0_16 = arith.constant 0 : index
      %15 = vector.load %arg5[%c0_15, %c0_16] : memref<1x128xf32, #tpu.memory_space<vmem>>, vector<1x128xf32>
      %16 = vector.broadcast %15 : vector<1x128xf32> to vector<64x128xf32>
      %17 = arith.addf %14, %16 : vector<64x128xf32>
      %c0_17 = arith.constant 0 : index
      %c0_18 = arith.constant 0 : index
      %18 = vector.load %arg6[%c0_17, %c0_18] : memref<64x128xf32, #tpu.memory_space<vmem>>, vector<64x128xf32>
      tpu.vector_store %arg6[%c0_17, %c0_18], %17 {strides = array<i32>} : memref<64x128xf32, #tpu.memory_space<vmem>>, vector<64x128xf32>,
    } else {
    }
    return
  }
  func.func @transform_0(%arg0: i32, %arg1: i32) -> (i32, i32) {
    %c0_i32 = arith.constant 0 : i32
    return %arg0, %arg1 : i32, i32
  }
  func.func @transform_1(%arg0: i32, %arg1: i32) -> (i32, i32) {
    %c0_i32 = arith.constant 0 : i32
    %c0_i32_0 = arith.constant 0 : i32
    return %arg1, %c0_i32 : i32, i32
  }
  func.func @transform_2(%arg0: i32, %arg1: i32) -> (i32, i32) {
    %c0_i32 = arith.constant 0 : i32
    %c0_i32_0 = arith.constant 0 : i32
    %c0_i32_1 = arith.constant 0 : i32
    return %c0_i32, %c0_i32_0 : i32, i32
  }
  func.func @transform_3(%arg0: i32, %arg1: i32) -> (i32, i32) {
    %c0_i32 = arith.constant 0 : i32
    %c0_i32_0 = arith.constant 0 : i32
    %c0_i32_1 = arith.constant 0 : i32
    return %c0_i32, %c0_i32_0 : i32, i32
  }
  func.func @transform_4(%arg0: i32, %arg1: i32) -> (i32, i32) {
    %c0_i32 = arith.constant 0 : i32
    %c0_i32_0 = arith.constant 0 : i32
    return %arg0, %c0_i32 : i32, i32
  }
}

</mosaic_0001>

<bundles_post_ra>
// kernel: tpu_custom_call.1
= control target key start
LH: loop header
LB: loop body
LE: loop exit
PB: predicated region body
PF: predicated region fallthrough
CT: control target
= control target key end

     0   :  { %9 = vsyncpa [#allocation4], 0  ;;  %s1498_s0 = inlined_call_operand.hbm [shape: f32[128,128], index: 0, kind: input, shape index: {}]   ;;  %s1499_s1 = inlined_call_operand.hbm [shape: f32[128,128], index: 1, kind: input, shape index: {}]   ;;  %s1500_s2 = inlined_call_operand.hbm [shape: f32[128,128], index: 2, kind: input, shape index: {}]   ;;  %s1501_s3 = inlined_call_operand.vmem [shape: f32[1,128], index: 3, kind: input, shape index: {}]   ;;  %s1502_s4 = inlined_call_operand.hbm [shape: f32[128,128], index: 4, kind: output, shape index: {}]  }
   0x1   :  { %11 = vsyncpa [#allocation4 + $0x1], 0 }
   0x2   :  { %12 = vsyncpa [#allocation7], 0 }
   0x3   :  { %13 = vsyncpa [#allocation5], 0 }
   0x4   :  { %15 = vsyncpa [#allocation5 + $0x1], 0  ;;  %s1217_s15 = smov 0   ;;  %s1219_s16 = smov 0  }
   0x5   :  { %s1221_s17 = smov 0   ;;  %s1223_s18 = smov 0  }
   0x6   :  { %s1225_s19 = smov 0   ;;  %s1227_s20 = smov 0  }
   0x7 LB: > { %s701_s21 = sadd.s32 4294967295, %s1182_s20   ;;  %s702_s22 = sadd.s32 4294967294, %s1182_s20   ;;  %s1182_s20 = sphi %s1227_s20, %s21_s20   ;;  %s1178_s19 = sphi %s1225_s19, %s1524_s19   ;;  %s1174_s18 = sphi %s1223_s18, %s1523_s18   ;;  %s1170_s17 = sphi %s1221_s17, %s1522_s17   ;;  %s1166_s16 = sphi %s1219_s16, %s1521_s16   ;;  %s1162_s15 = sphi %s1217_s15, %s1520_s15  }
   0x8   : > { %p55_p0 = scmp.ne.s32.totalorder %s1166_s16, %s1162_s15  ;;  %p1251_p1 = scmp.eq.s32.totalorder %s701_s21, 0 }
   0x9   : > { %p1255_p2 = scmp.eq.s32.totalorder %s701_s21, 1  ;;  %p153_p3 = scmp.eq.s32.totalorder %s702_s22, 1 }
   0xa   : > { %s1507_s23 = scalar_select %p1251_p1, 1, 0 }
   0xb   : > { %p1261_p4 = por %p1251_p1, %p55_p0  ;;  %p703_p5 = scmp.ge.s32.totalorder %s1182_s20, 1 }
   0xc   : > { %p1266_p6 = por %p153_p3, %p55_p0  ;;  %p160_p7 = scmp.lt.s32.totalorder %s1182_s20, 3 }
   0xd   : > { %s1509_s25 = scalar_select %p1261_p4, 1, 0 }
   0xe   : > { %s1510_s26 = scalar_select %p1266_p6, 1, 0 }
   0xf   : > { %p1271_p8 = pnand %p703_p5, %p160_p7  ;;  %s1184_s28 = smov [#allocation6]  }
  0x10   : > { %s175_s29 = sshll.u32 %s1184_s28, 4  ;;  %s1185_s5 = smov [#allocation8]   ;;  %s1275_s29 = int_to_ptr.vmem [resolvable:$true] %s175_s29 }
  0x11   : > { %p935_p9 = pneg %p1271_p8  ;;  %s188_s6 = sshll.u32 %s1185_s5, 4  ;;  %s1286_s6 = int_to_ptr.vmem [resolvable:$true] %s188_s6 }
  0x12   : > { %s1010_s9 = scalar_lea.hbm %s1499_s1, 2048 }
  0x13   : > { %p1282_p11 = pnand %p935_p9, %p1251_p1  ;;  %p1011_p12 = scmp.ne.s32.totalorder %s1499_s1, %s1010_s9 }
  0x14   : > { %p1017_p5 = scmp.lt.u32.totalorder %s1010_s9, %s1499_s1 }
  0x15   : > { %p1012_p13 = pneg %p1282_p11 }
  0x17   : > { %p1013_p0 = pnand %p1012_p13, %p1011_p12 }
  0x19   : > { %p1014_p3 = pneg %p1013_p0 }
  0x1b   : > { %p1019_p7 = pnand %p1017_p5, %p1014_p3 }
  0x1d   : > { %1022 = shalt.err (!%p1019_p7)
}
  0x1e   : > { %s1023_s14 = scalar_lea.vmem %s1275_s29, 2048  ;;  %p1031_p1 = scmp.lt.s32.totalorder %s1275_s29, %s1275_s29 }
  0x1f   : > { %p1024_p9 = scmp.ne.s32.totalorder %s1275_s29, %s1023_s14  ;;  %p1032_p12 = scmp.lt.s32.totalorder %s1023_s14, %s1023_s14 }
  0x21   : > { %p1026_p10 = pnand %p1024_p9, %p1012_p13  ;;  %p1033_p0 = por %p1032_p12, %p1031_p1 }
  0x23   : > { %p1027_p6 = pneg %p1026_p10 }
  0x25   : > { %p1034_p4 = pnand %p1033_p0, %p1027_p6 }
  0x27   : > { %1037 = shalt.err (!%p1034_p4)
}
  0x28   : > { %s1186_s21 = smov 128   ;;  %s1187_s22 = smov 8  }
  0x29   : > { %938 = dma.hbm_to_vmem [thread:$0]  (!%p1282_p11), %s1499_s1, 2048, %s1275_s29, [#allocation7], %s1186_s21, %s1186_s21, %s1187_s22  }
  0x2a   : > { %s1038_s9 = scalar_lea.hbm %s1500_s2, 2048 }
  0x2b   : > { %p1039_p1 = scmp.ne.s32.totalorder %s1500_s2, %s1038_s9  ;;  %p1045_p10 = scmp.lt.u32.totalorder %s1038_s9, %s1500_s2 }
  0x2d   : > { %p1041_p4 = pnand %p1039_p1, %p1012_p13 }
  0x2f   : > { %p1042_p6 = pneg %p1041_p4 }
  0x31   : > { %p1047_p3 = pnand %p1045_p10, %p1042_p6 }
  0x33   : > { %1050 = shalt.err (!%p1047_p3)
}
  0x34   : > { %s1051_s29 = scalar_lea.vmem %s1286_s6, 2048  ;;  %p1059_p12 = scmp.lt.s32.totalorder %s1286_s6, %s1286_s6 }
  0x35   : > { %p1052_p5 = scmp.ne.s32.totalorder %s1286_s6, %s1051_s29  ;;  %p1060_p0 = scmp.lt.s32.totalorder %s1051_s29, %s1051_s29 }
  0x37   : > { %p1054_p7 = pnand %p1052_p5, %p1012_p13  ;;  %p1061_p1 = por %p1060_p0, %p1059_p12 }
  0x39   : > { %p1055_p9 = pneg %p1054_p7 }
  0x3b   : > { %p1062_p4 = pnand %p1061_p1, %p1055_p9 }
  0x3d   : > { %1065 = shalt.err (!%p1062_p4)
}
  0x3e   : > { %941 = dma.hbm_to_vmem [thread:$0]  (!%p1282_p11), %s1500_s2, 2048, %s1286_s6, [#allocation7], %s1186_s21, %s1186_s21, %s1187_s22  }
  0x3f   : > { %s33_s30 = sadd.s32 1, %s1178_s19  ;;  %s42_s5 = sadd.s32 1, %s1170_s17 }
  0x40   : > { %p35_p13 = scmp.ge.s32.totalorder %s33_s30, 2  ;;  %p49_p6 = scmp.ne.s32.totalorder %s1170_s17, %s1166_s16 }
  0x41   : > { %p50_p10 = scmp.eq.s32.totalorder %s1182_s20, 0  ;;  %p952_p3 = scmp.lt.s32.totalorder %s1182_s20, 2 }
  0x42   : > { %s1526_s30 = smov (%p35_p13, %s33_s30), 0  ;;  %p1356_p7 = por %p1255_p2, %p49_p6 }
  0x43   : > { %p51_p5 = por %p50_p10, %p49_p6  ;;  %s37_s8 = ssub.s32 %s1178_s19, %s1526_s30 }
  0x44   : > { %s1513_s7 = scalar_select %p1356_p7, 1, 0 }
  0x45   : > { %s205_s9 = sand.u32 1, %s1170_s17   ;;  %p40_p9 = scmp.eq.s32.totalorder %s37_s8, 0 }
  0x46   : > { %s707_s6 = sshll.u32 %s205_s9, 6  ;;  %s721_s10 = sshll.u32 %s1178_s19, 10 }
  0x47   : > { %s1365_s11 = scalar_select %p40_p9, %s1170_s17, %s42_s5  }
  0x48   : > { %s1370_s29 = scalar_lea.hbm %s1498_s0, %s721_s10  ;;  %s209_s24 = scalar_lea.vmem [#allocation3], %s707_s6 }
  0x49   : > { %s217_s14 = sshll.u32 %s209_s24, 4  ;;  %p1374_p2 = pnand %p952_p3, %p51_p5  ;;  %s1378_s14 = int_to_ptr.vmem [resolvable:$true] %s217_s14 }
  0x4a   : > { %s1380_s5 = scalar_lea.sflag [#allocation4], %s205_s9  ;;  %s1066_s8 = scalar_lea.hbm %s1370_s29, 1024 }
  0x4b   : > { %p1067_p11 = scmp.ne.s32.totalorder %s1370_s29, %s1066_s8  ;;  %p1068_p12 = pneg %p1374_p2 }
  0x4c   : > { %s1071_s12 = scalar_lea.hbm %s1498_s0, 2048  ;;  %p1072_p4 = scmp.lt.u32.totalorder %s1370_s29, %s1498_s0 }
  0x4d   : > { %p1069_p0 = pnand %p1068_p12, %p1067_p11  ;;  %p1073_p13 = scmp.lt.u32.totalorder %s1071_s12, %s1066_s8 }
  0x4e   : > { %p1075_p10 = scmp.lt.u32.totalorder %s1066_s8, %s1370_s29 }
  0x4f   : > { %p1070_p1 = pneg %p1069_p0  ;;  %p1074_p6 = por %p1073_p13, %p1072_p4 }
  0x51   : > { %p1076_p3 = por %p1075_p10, %p1074_p6 }
  0x53   : > { %p1077_p5 = pnand %p1076_p3, %p1070_p1 }
  0x55   : > { %1080 = shalt.err (!%p1077_p5)
}
  0x56   : > { %s1081_s9 = scalar_lea.vmem %s1378_s14, 1024  ;;  %s1188_s6 = smov [#allocation3]  }
  0x57   : > { %p1082_p9 = scmp.ne.s32.totalorder %s1378_s14, %s1081_s9  ;;  %s1086_s10 = sshll.u32 %s1188_s6, 4  ;;  %s1087_s10 = int_to_ptr.vmem [resolvable:$false] %s1086_s10 }
  0x58   : > { %s1088_s13 = scalar_lea.vmem %s1087_s10, 2048  ;;  %p1089_p7 = scmp.lt.s32.totalorder %s1378_s14, %s1087_s10 }
  0x59   : > { %p1084_p11 = pnand %p1082_p9, %p1068_p12  ;;  %p1090_p4 = scmp.lt.s32.totalorder %s1088_s13, %s1081_s9 }
  0x5b   : > { %p1085_p0 = pneg %p1084_p11  ;;  %p1091_p13 = por %p1090_p4, %p1089_p7 }
  0x5d   : > { %p1092_p6 = pnand %p1091_p13, %p1085_p0 }
  0x5f   : > { %1095 = shalt.err (!%p1092_p6)
}
  0x60   : > { %945 = dma.hbm_to_vmem [thread:$0]  (!%p1374_p2), %s1370_s29, 1024, %s1378_s14, %s1380_s5, %s1186_s21, %s1186_s21, %s1187_s22  }
  0x61   : > { %229 = sbr.rel (%p1271_p8) target bundleno = 599 (0x257), region = 36  ;;  %s1414_s8 = sand.u32 (!%p1271_p8), 1, %s1166_s16  }
  0x62   : > { %s711_s12 = sshll.u32 (!%p1271_p8), %s1414_s8, 6  ;;  %s232_s24 = scalar_lea.sflag (!%p1271_p8), [#allocation4], %s1414_s8 }
  0x63   : > { %s1420_s28 = scalar_lea.vmem (!%p1271_p8), [#allocation3], %s711_s12  ;;  %p1515_p7 = scmp.ne.s32.totalorder (!%p1271_p8), %s1509_s25, 0 }
  0x68   : > { %1149 = dma.done.wait (%p1515_p7), %s232_s24, 1024  }
  0x69   : > { %1151 = vsyncadd (%p1515_p7), %s232_s24, 4294966272  ;;  %p1516_p2 = scmp.ne.s32.totalorder %s1507_s23, 0 }
  0x6b   : > { %1153 = dma.done.wait (%p1516_p2), [#allocation7], 4096  }
  0x6c   : > { %1155 = vsyncadd (%p1516_p2), [#allocation7], 4294963200  ;;  %v299_v0 = vld [vmem:[#allocation6] sm:$0xff]  ;;  %v300_v1 = vld [vmem:[#allocation6 + $0x8] sm:$0xff]  ;;  %s267_s27 = scalar_lea.vmem [#allocation9], %s711_s12  ;;  %s722_s22 = sshll.u32 %s1174_s18, 10 }
  0x6d   : > { %v301_v2 = vld [vmem:[#allocation6 + $0x10] sm:$0xff]  ;;  %v859_v3 = vpack.c.bf16 %v300_v1, %v299_v0  ;;  %v302_v4 = vld [vmem:[#allocation6 + $0x18] sm:$0xff]  ;;  %v303_v6 = vld [vmem:[#allocation6 + $0x20] sm:$0xff]  ;;  %s597_s21 = sshll.u32 %s267_s27, 4  ;;  %s1449_s5 = scalar_lea.hbm %s1502_s4, %s722_s22  ;;  %s1444_s21 = int_to_ptr.vmem [resolvable:$true] %s597_s21 }
  0x6e   : > { %v863_v5 = vpack.c.bf16 %v302_v4, %v301_v2  ;;  %v304_v7 = vld [vmem:[#allocation6 + $0x28] sm:$0xff]  ;;  %v291_v9 = vld [vmem:[%s1420_s28] sm:$0xff]  ;;  %v305_v10 = vld [vmem:[#allocation6 + $0x30] sm:$0xff]  ;;  %s584_s9 = scalar_lea.sflag [#allocation5], %s1414_s8  ;;  %s1096_s18 = scalar_lea.vmem %s1444_s21, 1024 }
  0x6f   : > { %860 = vmatprep.subr.bf16.mxu0 %v859_v3  ;;  %v867_v8 = vpack.c.bf16 %v304_v7, %v303_v6  ;;  %v306_v11 = vld [vmem:[#allocation6 + $0x38] sm:$0xff]  ;;  %803 = vmatprep.mubr.f32.mxu0 %v291_v9  ;;  %v447_v12 = vld [vmem:[#allocation8] sm:$0xff]  ;;  %v448_v13 = vld [vmem:[#allocation8 + $0x8] sm:$0xff]  ;;  %p1097_p8 = scmp.ne.s32.totalorder %s1444_s21, %s1096_s18  ;;  %p1517_p12 = scmp.ne.s32.totalorder %s1513_s7, 0 }
  0x70   : > { %862 = vmatpush3.bf16.msra.mxu0 %v859_v3  ;;  %v449_v14 = vld [vmem:[#allocation8 + $0x10] sm:$0xff]  ;;  %v871_v15 = vpack.c.bf16 %v306_v11, %v305_v10  ;;  %v307_v16 = vld [vmem:[#allocation6 + $0x40] sm:$0xff]  ;;  %v891_v17 = vpack.c.bf16 %v448_v13, %v447_v12  ;;  %v450_v18 = vld [vmem:[#allocation8 + $0x18] sm:$0xff]  ;;  %s1189_s6 = smov [#allocation9]  }
  0x71   : > { %864 = vmatprep.subr.bf16.mxu0 %v863_v5  ;;  %v308_v19 = vld [vmem:[#allocation6 + $0x48] sm:$0xff]  ;;  %v895_v20 = vpack.c.bf16 %v450_v18, %v449_v14  ;;  %v451_v21 = vld [vmem:[#allocation8 + $0x20] sm:$0xff]  ;;  %v309_v24 = vld [vmem:[#allocation6 + $0x50] sm:$0xff]  ;;  %p1098_p1 = pnand %p1097_p8, %p1517_p12  ;;  %s1100_s10 = sshll.u32 %s1189_s6, 4  ;;  %s1101_s10 = int_to_ptr.vmem [resolvable:$false] %s1100_s10 }
  0x72   : > { %v452_v22 = vld [vmem:[#allocation8 + $0x28] sm:$0xff]  ;;  %892 = vmatprep.subr.bf16.mxu1 %v891_v17  ;;  %v875_v23 = vpack.c.bf16 %v308_v19, %v307_v16  ;;  %v310_v26 = vld [vmem:[#allocation6 + $0x58] sm:$0xff]  ;;  %v453_v27 = vld [vmem:[#allocation8 + $0x30] sm:$0xff]  ;;  %s1102_s13 = scalar_lea.vmem %s1101_s10, 2048  ;;  %p1103_p3 = scmp.lt.s32.totalorder %s1444_s21, %s1101_s10 }
  0x73   : > { %894 = vmatpush3.bf16.msra.mxu1 %v891_v17  ;;  %v899_v25 = vpack.c.bf16 %v452_v22, %v451_v21  ;;  %v454_v28 = vld [vmem:[#allocation8 + $0x38] sm:$0xff]  ;;  %v879_v29 = vpack.c.bf16 %v310_v26, %v309_v24  ;;  %v311_v30 = vld [vmem:[#allocation6 + $0x60] sm:$0xff]  ;;  %v312_v32 = vld [vmem:[#allocation6 + $0x68] sm:$0xff]  ;;  %p1099_p10 = pneg %p1098_p1  ;;  %p1104_p5 = scmp.lt.s32.totalorder %s1102_s13, %s1096_s18 }
  0x74   : > { %866 = vmatpush3.bf16.msra.mxu0 %v863_v5  ;;  %896 = vmatprep.subr.bf16.mxu1 %v895_v20  ;;  %v903_v31 = vpack.c.bf16 %v454_v28, %v453_v27  ;;  %v455_v33 = vld [vmem:[#allocation8 + $0x40] sm:$0xff]  ;;  %v456_v34 = vld [vmem:[#allocation8 + $0x48] sm:$0xff]  ;;  %v883_v35 = vpack.c.bf16 %v312_v32, %v311_v30  ;;  %v313_v36 = vld [vmem:[#allocation6 + $0x70] sm:$0xff] }
  0x75   : > { %868 = vmatprep.subr.bf16.mxu0 %v867_v8  ;;  %v907_v37 = vpack.c.bf16 %v456_v34, %v455_v33  ;;  %v314_v38 = vld [vmem:[#allocation6 + $0x78] sm:$0xff]  ;;  %v457_v39 = vld [vmem:[#allocation8 + $0x50] sm:$0xff]  ;;  %v459_v43 = vld [vmem:[#allocation8 + $0x60] sm:$0xff]  ;;  %p1105_p9 = por %p1104_p5, %p1103_p3 }
  0x76   : > { %v458_v40 = vld [vmem:[#allocation8 + $0x58] sm:$0xff]  ;;  %v887_v41 = vpack.c.bf16 %v314_v38, %v313_v36  ;;  %v460_v44 = vld [vmem:[#allocation8 + $0x68] sm:$0xff]  ;;  %v461_v46 = vld [vmem:[#allocation8 + $0x70] sm:$0xff] }
  0x77   : > { %898 = vmatpush3.bf16.msra.mxu1 %v895_v20  ;;  %v911_v42 = vpack.c.bf16 %v458_v40, %v457_v39  ;;  %v915_v45 = vpack.c.bf16 %v460_v44, %v459_v43  ;;  %v462_v47 = vld [vmem:[#allocation8 + $0x78] sm:$0xff]  ;;  %v292_v48 = vld [vmem:[%s1420_s28 + $0x8] sm:$0xff]  ;;  %v293_v49 = vld [vmem:[%s1420_s28 + $0x10] sm:$0xff]  ;;  %p1106_p11 = pnand %p1105_p9, %p1099_p10 }
  0x78   : > { %870 = vmatpush3.bf16.msra.mxu0 %v867_v8  ;;  %900 = vmatprep.subr.bf16.mxu1 %v899_v25  ;;  %v919_v50 = vpack.c.bf16 %v462_v47, %v461_v46  ;;  %v294_v51 = vld [vmem:[%s1420_s28 + $0x18] sm:$0xff]  ;;  %v295_v52 = vld [vmem:[%s1420_s28 + $0x20] sm:$0xff]  ;;  %v296_v53 = vld [vmem:[%s1420_s28 + $0x28] sm:$0xff] }
  0x79   : > { %872 = vmatprep.subr.bf16.mxu0 %v871_v15  ;;  %v297_v54 = vld [vmem:[%s1420_s28 + $0x30] sm:$0xff]  ;;  %v298_v55 = vld [vmem:[%s1420_s28 + $0x38] sm:$0xff]  ;;  %v715_v0 = vld [vmem:[%s1501_s3] ss:$0 sm:$0xff] }
  0x7b   : > { %902 = vmatpush3.bf16.msra.mxu1 %v899_v25 }
  0x7c   : > { %874 = vmatpush3.bf16.msra.mxu0 %v871_v15  ;;  %904 = vmatprep.subr.bf16.mxu1 %v903_v31 }
  0x7d   : > { %876 = vmatprep.subr.bf16.mxu0 %v875_v23 }
  0x7f   : > { %906 = vmatpush3.bf16.msra.mxu1 %v903_v31 }
  0x80   : > { %878 = vmatpush3.bf16.msra.mxu0 %v875_v23  ;;  %908 = vmatprep.subr.bf16.mxu1 %v907_v37 }
  0x81   : > { %880 = vmatprep.subr.bf16.mxu0 %v879_v29 }
  0x83   : > { %910 = vmatpush3.bf16.msra.mxu1 %v907_v37 }
  0x84   : > { %882 = vmatpush3.bf16.msra.mxu0 %v879_v29  ;;  %912 = vmatprep.subr.bf16.mxu1 %v911_v42 }
  0x85   : > { %884 = vmatprep.subr.bf16.mxu0 %v883_v35 }
  0x87   : > { %914 = vmatpush3.bf16.msra.mxu1 %v911_v42 }
  0x88   : > { %886 = vmatpush3.bf16.msra.mxu0 %v883_v35  ;;  %916 = vmatprep.subr.bf16.mxu1 %v915_v45 }
  0x89   : > { %888 = vmatprep.subr.bf16.mxu0 %v887_v41 }
  0x8b   : > { %918 = vmatpush3.bf16.msra.mxu1 %v915_v45 }
  0x8c   : > { %890 = vmatpush3.bf16.msra.mxu0 %v887_v41  ;;  %920 = vmatprep.subr.bf16.mxu1 %v919_v50 }
  0x8f   : > { %804 = vmatmul.mubr.f32.vlgmr.msra.gmra.mrb[0].mxu0 %v292_v48  ;;  %922 = vmatpush3.bf16.msra.mxu1 %v919_v50 }
  0x90   : > { %806 = vmatprep.mubr.f32.mxu0 %v293_v49 }
  0x93   : > { %807 = vmatmul.mubr.f32.gmra.mrb[2].mxu0 %v294_v51 }
  0x94   : > { %809 = vmatprep.mubr.f32.mxu0 %v295_v52 }
  0x97   : > { %810 = vmatmul.mubr.f32.gmra.mrb[4].mxu0 %v296_v53 }
  0x98   : > { %812 = vmatprep.mubr.f32.mxu0 %v297_v54 }
  0x9b   : > { %813 = vmatmul.mubr.f32.gmra.mrb[6].mxu0 %v298_v55 }
 0x162   : > { %v805_v56 = vpop.f32.mrb[0].mxu0 }
 0x163   : > { %v381_v57 = vpop.f32.mrb[1].mxu0 }
 0x164   : > { %847 = vmatprep.mubr.f32.mxu1 %v381_v57 }
 0x165   : > { %848 = vmatmul.mubr.f32.vlgmr.msra.gmra.mrb[0].mxu1 %v805_v56 }
 0x166   : > { %v808_v58 = vpop.f32.mrb[2].mxu0 }
 0x167   : > { %v391_v59 = vpop.f32.mrb[3].mxu0 }
 0x168   : > { %850 = vmatprep.mubr.f32.mxu1 %v391_v59 }
 0x169   : > { %851 = vmatmul.mubr.f32.gmra.mrb[2].mxu1 %v808_v58 }
 0x16a   : > { %v811_v60 = vpop.f32.mrb[4].mxu0 }
 0x16b   : > { %v401_v61 = vpop.f32.mrb[5].mxu0 }
 0x16c   : > { %853 = vmatprep.mubr.f32.mxu1 %v401_v61 }
 0x16d   : > { %854 = vmatmul.mubr.f32.gmra.mrb[4].mxu1 %v811_v60 }
 0x16e   : > { %v814_v62 = vpop.f32.mrb[6].mxu0 }
 0x16f   : > { %v411_v63 = vpop.f32.mrb[7].mxu0 }
 0x170   : > { %856 = vmatprep.mubr.f32.mxu1 %v411_v63 }
 0x171   : > { %857 = vmatmul.mubr.f32.gmra.mrb[6].mxu1 %v814_v62 }
 0x238   : > { %v849_v1 = vpop.f32.mrb[0].mxu1 }
 0x239   : > { %v542_v2 = vadd.f32 %v849_v1, %v715_v0  ;;  %v536_v3 = vpop.f32.mrb[1].mxu1 }
 0x23a   : > { %v537_v4 = vadd.f32 %v715_v0, %v536_v3 }
 0x23b   : > { %576 = vst [vmem:[%s267_s27 + $0x8] sm:$0xff] %v542_v2 }
 0x23c   : > { %575 = vst [vmem:[%s267_s27] sm:$0xff] %v537_v4  ;;  %v852_v5 = vpop.f32.mrb[2].mxu1 }
 0x23d   : > { %v552_v6 = vadd.f32 %v852_v5, %v715_v0  ;;  %v546_v7 = vpop.f32.mrb[3].mxu1 }
 0x23e   : > { %v547_v8 = vadd.f32 %v715_v0, %v546_v7 }
 0x23f   : > { %578 = vst [vmem:[%s267_s27 + $0x18] sm:$0xff] %v552_v6 }
 0x240   : > { %577 = vst [vmem:[%s267_s27 + $0x10] sm:$0xff] %v547_v8  ;;  %v855_v9 = vpop.f32.mrb[4].mxu1 }
 0x241   : > { %v562_v10 = vadd.f32 %v855_v9, %v715_v0  ;;  %v556_v11 = vpop.f32.mrb[5].mxu1 }
 0x242   : > { %v557_v12 = vadd.f32 %v715_v0, %v556_v11 }
 0x243   : > { %580 = vst [vmem:[%s267_s27 + $0x28] sm:$0xff] %v562_v10 }
 0x244   : > { %579 = vst [vmem:[%s267_s27 + $0x20] sm:$0xff] %v557_v12  ;;  %v858_v13 = vpop.f32.mrb[6].mxu1 }
 0x245   : > { %v572_v14 = vadd.f32 %v858_v13, %v715_v0  ;;  %v566_v15 = vpop.f32.mrb[7].mxu1 }
 0x246   : > { %v567_v16 = vadd.f32 %v715_v0, %v566_v15 }
 0x247   : > { %582 = vst [vmem:[%s267_s27 + $0x38] sm:$0xff] %v572_v14 }
 0x248   : > { %581 = vst [vmem:[%s267_s27 + $0x30] sm:$0xff] %v567_v16 }
 0x249   : > { %1109 = shalt.err (!%p1106_p11)
}
 0x24a   : > { %s1110_s12 = scalar_lea.hbm %s1449_s5, 1024  ;;  %s1114_s23 = scalar_lea.hbm %s1502_s4, 2048 }
 0x24b   : > { %p1111_p0 = scmp.ne.s32.totalorder %s1449_s5, %s1110_s12  ;;  %p1115_p6 = scmp.lt.u32.totalorder %s1449_s5, %s1502_s4 }
 0x24c   : > { %p1116_p7 = scmp.lt.u32.totalorder %s1114_s23, %s1110_s12  ;;  %p1118_p8 = scmp.lt.u32.totalorder %s1110_s12, %s1449_s5 }
 0x24d   : > { %p1112_p4 = pnand %p1111_p0, %p1517_p12 }
 0x24e   : > { %p1117_p2 = por %p1116_p7, %p1115_p6 }
 0x24f   : > { %p1113_p13 = pneg %p1112_p4 }
 0x250   : > { %p1119_p1 = por %p1118_p8, %p1117_p2 }
 0x252   : > { %p1120_p10 = pnand %p1119_p1, %p1113_p13 }
 0x254   : > { %1123 = shalt.err (!%p1120_p10)
}
 0x255   : > { %s1190_s22 = smov 128   ;;  %s1191_s29 = smov 8  }
 0x256   : > { %933 = dma.vmem_to_hbm [thread:$0]  (%p1517_p12), %s1444_s21, 1024, %s1449_s5, %s584_s9, %s1190_s22, %s1190_s22, %s1191_s29  }
 0x257 PF: > { %s612_s14 = sand.u32 1, %s1162_s15   ;;  %p1518_p3 = scmp.ne.s32.totalorder %s1510_s26, 0 }
 0x258   : > { %p1519_p5 = scmp.ge.s32.totalorder %s1182_s20, 2  ;;  %s613_s18 = scalar_lea.sflag [#allocation5], %s612_s14 }
 0x25a   : > { %p947_p9 = pnand %p1519_p5, %p1518_p3 }
 0x25c   : > { %1157 = dma.done.wait (!%p947_p9), %s613_s18, 1024  }
 0x25d   : > { %1159 = vsyncadd (!%p947_p9), %s613_s18, 4294966272  ;;  %s21_s20 = sadd.s32 1, %s1182_s20   ;;  %s1520_s15 = smov %s1166_s16 }
 0x25e   : > { %p18_p11 = scmp.ge.s32.totalorder %s21_s20, 4   ;;  %s1521_s16 = smov %s1170_s17 }
 0x25f   : > { %s1522_s17 = smov %s1365_s11  ;;  %s1523_s18 = smov %s1178_s19 }
 0x260   : > { %s1524_s19 = smov %s1526_s30  ;;  %20 = sbr.rel (!%p18_p11) target bundleno = 7 (0x7), region = 98 }
 0x267   :  { %618 = vsyncpa [#allocation4], 1 }
 0x268   :  { %620 = vsyncpa [#allocation4 + $0x1], 1 }
 0x269   :  { %621 = vsyncpa [#allocation7], 1 }
 0x26a   :  { %622 = vsyncpa [#allocation5], 1 }
 0x26b   :  { %624 = vsyncpa [#allocation5 + $0x1], 1 }

</bundles_post_ra>
